<compile_context>
chip_gen: v6e
topology: v6e:2x2x1
jax: 0.10.0
libtpu: 0.0.40
codegen_flags: <defaults>
</compile_context>

<pallas_src>
import functools

import jax
import jax.numpy as jnp
from jax.experimental import pallas as pl
from jax.experimental.pallas import tpu as pltpu

ENVMAX = [1, 4]
OVERLAY_CNT = 1
IN_FEATURES = 31   # true flattened feature count
IN_PAD = 32        # 8-aligned K for the first matmul (padded in-kernel)
H1 = 512
H2 = 128
OUT_PAD = 128      # lane-dense output width (real outputs live in lanes [:out_dim])
POL_DIM = ENVMAX[1]
VAL_DIM = 1
MAX_TILE = 1024    # batch row-tile cap (>=256 to amortize grid-step overhead,
                   # small enough for v7x's 64 MiB VMEM without vmem_limit tweaks)


# ---------------------------------------------------------------------------
# Kernels
# ---------------------------------------------------------------------------
def _pad_input(x_ref, xpad_ref):
    """In-kernel K pad 31 -> 32: zero pad lane + masked store (no HBM round trip)."""
    xpad_ref[...] = jnp.zeros(xpad_ref.shape, xpad_ref.dtype)
    xpad_ref[:, :IN_FEATURES] = x_ref[...]
    return xpad_ref[...].astype(jnp.bfloat16)


def _single_head_kernel(x_ref, w1, b1, w2, b2, w3, b3, o_ref, xpad_ref):
    """One 3-layer MLP head. bf16 MXU inputs, f32 accumulation, f32 epilogue."""
    x_bf = _pad_input(x_ref, xpad_ref)
    h1 = jnp.dot(x_bf, w1[...], preferred_element_type=jnp.float32) + b1[...]
    h1 = jnp.maximum(h1, 0.0).astype(jnp.bfloat16)
    h2 = jnp.dot(h1, w2[...], preferred_element_type=jnp.float32) + b2[...]
    h2 = jnp.maximum(h2, 0.0).astype(jnp.bfloat16)
    out = jnp.dot(h2, w3[...], preferred_element_type=jnp.float32) + b3[...]
    o_ref[...] = out.astype(o_ref.dtype)  # padded lanes are exact zeros (zero-padded w3/b3)


def _fused_heads_kernel(x_ref, w1, b1, w2a, b2a, w2b, b2b, w3, b3,
                        o_ref, xpad_ref):
    """Both heads in one launch: shared layer-1 matmul, combined final matmul."""
    x_bf = _pad_input(x_ref, xpad_ref)
    # Layer 1 of BOTH heads in a single MXU pass (shared LHS, (32, 1024) weights).
    h1 = jnp.dot(x_bf, w1[...], preferred_element_type=jnp.float32) + b1[...]   # (T, 1024)
    h1 = jnp.maximum(h1, 0.0).astype(jnp.bfloat16)
    # Layer 2 per head (kept as two dots: block-diagonal fusion would double MXU work).
    h2a = jnp.maximum(
        jnp.dot(h1[:, :H1], w2a[...], preferred_element_type=jnp.float32) + b2a[...], 0.0)
    h2b = jnp.maximum(
        jnp.dot(h1[:, H1:], w2b[...], preferred_element_type=jnp.float32) + b2b[...], 0.0)
    # Final layers of both heads combined into ONE (256, 128) matmul:
    # lanes 0:4 = policy, lane 4 = value, remaining lanes exact zeros.
    h2 = jnp.concatenate([h2a, h2b], axis=1).astype(jnp.bfloat16)                # (T, 256)
    out = jnp.dot(h2, w3[...], preferred_element_type=jnp.float32) + b3[...]     # (T, 128)
    o_ref[...] = out.astype(o_ref.dtype)


# ---------------------------------------------------------------------------
# Wrappers
# ---------------------------------------------------------------------------
def _tile_rows(batch):
    return batch if batch <= MAX_TILE else MAX_TILE


def _build_call(kernel, x2d, weights, flops_per_row):
    batch = x2d.shape[0]
    tile = _tile_rows(batch)
    grid = (pl.cdiv(batch, tile),)
    bytes_accessed = int(
        x2d.size * x2d.dtype.itemsize
        + sum(w.size * w.dtype.itemsize for w in weights)
        + batch * OUT_PAD * 4)
    return pl.pallas_call(
        kernel,
        out_shape=jax.ShapeDtypeStruct((batch, OUT_PAD), jnp.float32),
        grid=grid,
        in_specs=[pl.BlockSpec((tile, IN_FEATURES), lambda i: (i, 0))]
                 + [pl.BlockSpec(w.shape, lambda i: (0, 0)) for w in weights],
        out_specs=pl.BlockSpec((tile, OUT_PAD), lambda i: (i, 0)),
        scratch_shapes=[pltpu.VMEM((tile, IN_PAD), jnp.float32)],
        compiler_params=pltpu.CompilerParams(
            dimension_semantics=("parallel",)),     # shards row tiles across TCs (v7x)
        cost_estimate=pl.CostEstimate(
            flops=int(flops_per_row * batch),
            transcendentals=0,
            bytes_accessed=bytes_accessed),
    )


@functools.partial(jax.jit, static_argnames=("out_dim",))
def _run_single(x2d, w1, b1, w2, b2, w3, b3, *, out_dim):
    weights = (w1, b1, w2, b2, w3, b3)
    flops_per_row = 2 * (IN_PAD * H1 + H1 * H2 + H2 * OUT_PAD)
    out = _build_call(_single_head_kernel, x2d, weights, flops_per_row)(x2d, *weights)
    return out[:, :out_dim]


@jax.jit
def _run_fused(x2d, w1, b1, w2a, b2a, w2b, b2b, w3, b3):
    weights = (w1, b1, w2a, b2a, w2b, b2b, w3, b3)
    flops_per_row = 2 * (IN_PAD * 2 * H1 + 2 * H1 * H2 + 2 * H2 * OUT_PAD)
    out = _build_call(_fused_heads_kernel, x2d, weights, flops_per_row)(x2d, *weights)
    return out[:, :POL_DIM], out[:, POL_DIM:POL_DIM + VAL_DIM]


# ---------------------------------------------------------------------------
# Params (kernel-ready layout: (in, out) weights, bf16; padded K / output lanes)
# ---------------------------------------------------------------------------
def init_params(key):
    def linear(key, fan_in, fan_out):
        kw, kb = jax.random.split(key)
        # Mimic nn.Linear default init: U(-1/sqrt(fan_in), 1/sqrt(fan_in))
        bound = 1.0 / jnp.sqrt(jnp.float32(fan_in))
        w = jax.random.uniform(kw, (fan_in, fan_out), jnp.float32, -bound, bound)
        b = jax.random.uniform(kb, (1, fan_out), jnp.float32, -bound, bound)
        return w, b

    keys = jax.random.split(key, 6)
    w1a, b1a = linear(keys[0], IN_FEATURES, H1)
    w2a, b2a = linear(keys[1], H1, H2)
    w3a, b3a = linear(keys[2], H2, POL_DIM)
    w1b, b1b = linear(keys[3], IN_FEATURES, H1)
    w2b, b2b = linear(keys[4], H1, H2)
    w3b, b3b = linear(keys[5], H2, VAL_DIM)

    def pad_k(w):        # (31, n) -> (32, n) with a zero row (matches in-kernel x pad)
        return jnp.pad(w, ((0, IN_PAD - IN_FEATURES), (0, 0)))

    def pad_lanes(w, b):  # zero-pad output features to OUT_PAD lanes
        n = w.shape[1]
        return (jnp.pad(w, ((0, 0), (0, OUT_PAD - n))),
                jnp.pad(b, ((0, 0), (0, OUT_PAD - n))))

    w3a_p, b3a_p = pad_lanes(w3a, b3a)
    w3b_p, b3b_p = pad_lanes(w3b, b3b)
    bf = lambda a: a.astype(jnp.bfloat16)

    fc1 = (bf(pad_k(w1a)), b1a, bf(w2a), b2a, bf(w3a_p), b3a_p)
    fc2 = (bf(pad_k(w1b)), b1b, bf(w2b), b2b, bf(w3b_p), b3b_p)

    # Fused packing: layer 1 of both heads stacked along output lanes, and both
    # final layers packed into a single (2*H2, OUT_PAD) weight / (1, OUT_PAD) bias.
    w1f = jnp.concatenate([pad_k(w1a), pad_k(w1b)], axis=1)          # (32, 1024)
    b1f = jnp.concatenate([b1a, b1b], axis=1)                        # (1, 1024)
    w3f = jnp.zeros((2 * H2, OUT_PAD), jnp.float32)
    w3f = w3f.at[:H2, :POL_DIM].set(w3a)
    w3f = w3f.at[H2:, POL_DIM:POL_DIM + VAL_DIM].set(w3b)
    b3f = jnp.zeros((1, OUT_PAD), jnp.float32)
    b3f = b3f.at[:, :POL_DIM].set(b3a)
    b3f = b3f.at[:, POL_DIM:POL_DIM + VAL_DIM].set(b3b)
    fused = (bf(w1f), b1f, bf(w2a), b2a, bf(w2b), b2b, bf(w3f), b3f)

    return {"fc1": fc1, "fc2": fc2, "fused": fused}


def net_forward(params, x, k):
    """Equivalent of NET.forward(x, k): flatten then apply fc[k]."""
    x2d = x.reshape(x.shape[0], -1)          # x.view(x.size(0), -1)
    assert x2d.shape[1] == IN_FEATURES
    if k == 0:
        return _run_single(x2d, *params["fc1"], out_dim=POL_DIM)
    return _run_single(x2d, *params["fc2"], out_dim=VAL_DIM)


def net_forward_both(params, x):
    """Preferred PPO path: both heads (policy, value) in a single pallas_call."""
    x2d = x.reshape(x.shape[0], -1)
    assert x2d.shape[1] == IN_FEATURES
    return _run_fused(x2d, *params["fused"])


# ---------------------------------------------------------------------------
# Pure-JAX reference (emulates bf16 matmul inputs / f32 accumulation)
# ---------------------------------------------------------------------------
def _ref_head(x2d, w1, b1, w2, b2, w3, b3):
    def mm(a, w):
        a_bf = a.astype(jnp.bfloat16).astype(jnp.float32)
        return jnp.dot(a_bf, w.astype(jnp.float32),
                       preferred_element_type=jnp.float32)

    x_pad = jnp.pad(x2d, ((0, 0), (0, IN_PAD - IN_FEATURES)))
    h1 = jnp.maximum(mm(x_pad, w1) + b1, 0.0)
    h2 = jnp.maximum(mm(h1, w2) + b2, 0.0)
    return mm(h2, w3) + b3


if __name__ == "__main__":
    key = jax.random.PRNGKey(0)
    kp, kx = jax.random.split(key)
    params = init_params(kp)

    # Small input consistent with forward: (B, OVERLAY_CNT, 31) -> (B, 31).
    x = jax.random.normal(kx, (2, OVERLAY_CNT, IN_FEATURES), jnp.float32)

    out_policy = net_forward(params, x, 0)         # (2, 4)
    out_value = net_forward(params, x, 1)          # (2, 1)
    pol_fused, val_fused = net_forward_both(params, x)
    jax.block_until_ready((out_policy, out_value, pol_fused, val_fused))

    x2d = x.reshape(x.shape[0], -1)
    ref_policy = _ref_head(x2d, *params["fc1"])[:, :POL_DIM]
    ref_value = _ref_head(x2d, *params["fc2"])[:, :VAL_DIM]

    assert out_policy.shape == (2, POL_DIM)
    assert out_value.shape == (2, VAL_DIM)
    assert pol_fused.shape == (2, POL_DIM)
    assert val_fused.shape == (2, VAL_DIM)
    assert jnp.allclose(out_policy, ref_policy, atol=5e-3, rtol=5e-3)
    assert jnp.allclose(out_value, ref_value, atol=5e-3, rtol=5e-3)
    assert jnp.allclose(pol_fused, ref_policy, atol=5e-3, rtol=5e-3)
    assert jnp.allclose(val_fused, ref_value, atol=5e-3, rtol=5e-3)

    print("KERNEL_OK")
</pallas_src>

<mosaic_0001>
module attributes {stable_mosaic.version = 11 : i64} {
  func.func @_single_head_kernel(%arg0: i32, %arg1: memref<2x31xf32, #tpu.memory_space<vmem>>, %arg2: memref<32x512xbf16, #tpu.memory_space<vmem>>, %arg3: memref<1x512xf32, #tpu.memory_space<vmem>>, %arg4: memref<512x128xbf16, #tpu.memory_space<vmem>>, %arg5: memref<1x128xf32, #tpu.memory_space<vmem>>, %arg6: memref<128x128xbf16, #tpu.memory_space<vmem>>, %arg7: memref<1x128xf32, #tpu.memory_space<vmem>>, %arg8: memref<2x128xf32, #tpu.memory_space<vmem>>, %arg9: memref<2x32xf32, #tpu.memory_space<vmem>>) attributes {dimension_semantics = [#tpu.dimension_semantics<parallel>], iteration_bounds = array<i64: 1>, scalar_prefetch = 0 : i64, scratch_operands = 1 : i64, tpu.core_type = #tpu.core_type<tc>, window_params = [{transform_indices = @transform_0, window_bounds = array<i64: 2, 31>}, {pipeline_mode = #tpu.pipeline_mode<synchronous>, transform_indices = @transform_1, window_bounds = array<i64: 32, 512>}, {pipeline_mode = #tpu.pipeline_mode<synchronous>, transform_indices = @transform_2, window_bounds = array<i64: 1, 512>}, {pipeline_mode = #tpu.pipeline_mode<synchronous>, transform_indices = @transform_3, window_bounds = array<i64: 512, 128>}, {pipeline_mode = #tpu.pipeline_mode<synchronous>, transform_indices = @transform_4, window_bounds = array<i64: 1, 128>}, {pipeline_mode = #tpu.pipeline_mode<synchronous>, transform_indices = @transform_5, window_bounds = array<i64: 128, 128>}, {pipeline_mode = #tpu.pipeline_mode<synchronous>, transform_indices = @transform_6, window_bounds = array<i64: 1, 128>}, {transform_indices = @transform_7, window_bounds = array<i64: 2, 128>}]} {
    %cst = arith.constant 0.000000e+00 : f32
    %0 = vector.broadcast %cst : f32 to vector<2x32xf32>
    %c0 = arith.constant 0 : index
    %c0_0 = arith.constant 0 : index
    %1 = vector.load %arg9[%c0, %c0_0] : memref<2x32xf32, #tpu.memory_space<vmem>>, vector<2x32xf32>
    tpu.vector_store %arg9[%c0, %c0_0], %0 {strides = array<i32>} : memref<2x32xf32, #tpu.memory_space<vmem>>, vector<2x32xf32>,
    %c0_1 = arith.constant 0 : index
    %c0_2 = arith.constant 0 : index
    %2 = vector.load %arg1[%c0_1, %c0_2] : memref<2x31xf32, #tpu.memory_space<vmem>>, vector<2x31xf32>
    %c0_3 = arith.constant 0 : index
    %c0_4 = arith.constant 0 : index
    %3 = vector.load %arg9[%c0_3, %c0_4] : memref<2x32xf32, #tpu.memory_space<vmem>>, vector<2x31xf32>
    tpu.vector_store %arg9[%c0_3, %c0_4], %2 {strides = array<i32>} : memref<2x32xf32, #tpu.memory_space<vmem>>, vector<2x31xf32>,
    %c0_5 = arith.constant 0 : index
    %c0_6 = arith.constant 0 : index
    %4 = vector.load %arg9[%c0_5, %c0_6] : memref<2x32xf32, #tpu.memory_space<vmem>>, vector<2x32xf32>
    %5 = arith.truncf %4 : vector<2x32xf32> to vector<2x32xbf16>
    %c0_7 = arith.constant 0 : index
    %c0_8 = arith.constant 0 : index
    %6 = vector.load %arg2[%c0_7, %c0_8] : memref<32x512xbf16, #tpu.memory_space<vmem>>, vector<32x512xbf16>
    %cst_9 = arith.constant dense<0.000000e+00> : vector<2x512xf32>
    %7 = tpu.matmul %5, %6, %cst_9 {dimension_numbers = #tpu.dot_dimension_numbers<[1], [0], [0], [1], [0, 0, 1, 1], [], []>} : vector<2x32xbf16>, vector<32x512xbf16>, vector<2x512xf32> -> vector<2x512xf32>
    %c0_10 = arith.constant 0 : index
    %c0_11 = arith.constant 0 : index
    %8 = vector.load %arg3[%c0_10, %c0_11] : memref<1x512xf32, #tpu.memory_space<vmem>>, vector<1x512xf32>
    %9 = vector.broadcast %8 : vector<1x512xf32> to vector<2x512xf32>
    %10 = arith.addf %7, %9 : vector<2x512xf32>
    %cst_12 = arith.constant 0.000000e+00 : f32
    %11 = vector.broadcast %cst_12 : f32 to vector<2x512xf32>
    %12 = arith.maximumf %10, %11 : vector<2x512xf32>
    %13 = arith.truncf %12 : vector<2x512xf32> to vector<2x512xbf16>
    %c0_13 = arith.constant 0 : index
    %c0_14 = arith.constant 0 : index
    %14 = vector.load %arg4[%c0_13, %c0_14] : memref<512x128xbf16, #tpu.memory_space<vmem>>, vector<512x128xbf16>
    %cst_15 = arith.constant dense<0.000000e+00> : vector<2x128xf32>
    %15 = tpu.matmul %13, %14, %cst_15 {dimension_numbers = #tpu.dot_dimension_numbers<[1], [0], [0], [1], [0, 0, 1, 1], [], []>} : vector<2x512xbf16>, vector<512x128xbf16>, vector<2x128xf32> -> vector<2x128xf32>
    %c0_16 = arith.constant 0 : index
    %c0_17 = arith.constant 0 : index
    %16 = vector.load %arg5[%c0_16, %c0_17] : memref<1x128xf32, #tpu.memory_space<vmem>>, vector<1x128xf32>
    %17 = vector.broadcast %16 : vector<1x128xf32> to vector<2x128xf32>
    %18 = arith.addf %15, %17 : vector<2x128xf32>
    %cst_18 = arith.constant 0.000000e+00 : f32
    %19 = vector.broadcast %cst_18 : f32 to vector<2x128xf32>
    %20 = arith.maximumf %18, %19 : vector<2x128xf32>
    %21 = arith.truncf %20 : vector<2x128xf32> to vector<2x128xbf16>
    %c0_19 = arith.constant 0 : index
    %c0_20 = arith.constant 0 : index
    %22 = vector.load %arg6[%c0_19, %c0_20] : memref<128x128xbf16, #tpu.memory_space<vmem>>, vector<128x128xbf16>
    %cst_21 = arith.constant dense<0.000000e+00> : vector<2x128xf32>
    %23 = tpu.matmul %21, %22, %cst_21 {dimension_numbers = #tpu.dot_dimension_numbers<[1], [0], [0], [1], [0, 0, 1, 1], [], []>} : vector<2x128xbf16>, vector<128x128xbf16>, vector<2x128xf32> -> vector<2x128xf32>
    %c0_22 = arith.constant 0 : index
    %c0_23 = arith.constant 0 : index
    %24 = vector.load %arg7[%c0_22, %c0_23] : memref<1x128xf32, #tpu.memory_space<vmem>>, vector<1x128xf32>
    %25 = vector.broadcast %24 : vector<1x128xf32> to vector<2x128xf32>
    %26 = arith.addf %23, %25 : vector<2x128xf32>
    %c0_24 = arith.constant 0 : index
    %c0_25 = arith.constant 0 : index
    %27 = vector.load %arg8[%c0_24, %c0_25] : memref<2x128xf32, #tpu.memory_space<vmem>>, vector<2x128xf32>
    tpu.vector_store %arg8[%c0_24, %c0_25], %26 {strides = array<i32>} : memref<2x128xf32, #tpu.memory_space<vmem>>, vector<2x128xf32>,
    return
  }
  func.func @transform_0(%arg0: i32) -> (i32, i32) {
    %c0_i32 = arith.constant 0 : i32
    %c0_i32_0 = arith.constant 0 : i32
    return %arg0, %c0_i32 : i32, i32
  }
  func.func @transform_1(%arg0: i32) -> (i32, i32) {
    %c0_i32 = arith.constant 0 : i32
    %c0_i32_0 = arith.constant 0 : i32
    %c0_i32_1 = arith.constant 0 : i32
    return %c0_i32, %c0_i32_0 : i32, i32
  }
  func.func @transform_2(%arg0: i32) -> (i32, i32) {
    %c0_i32 = arith.constant 0 : i32
    %c0_i32_0 = arith.constant 0 : i32
    %c0_i32_1 = arith.constant 0 : i32
    return %c0_i32, %c0_i32_0 : i32, i32
  }
  func.func @transform_3(%arg0: i32) -> (i32, i32) {
    %c0_i32 = arith.constant 0 : i32
    %c0_i32_0 = arith.constant 0 : i32
    %c0_i32_1 = arith.constant 0 : i32
    return %c0_i32, %c0_i32_0 : i32, i32
  }
  func.func @transform_4(%arg0: i32) -> (i32, i32) {
    %c0_i32 = arith.constant 0 : i32
    %c0_i32_0 = arith.constant 0 : i32
    %c0_i32_1 = arith.constant 0 : i32
    return %c0_i32, %c0_i32_0 : i32, i32
  }
  func.func @transform_5(%arg0: i32) -> (i32, i32) {
    %c0_i32 = arith.constant 0 : i32
    %c0_i32_0 = arith.constant 0 : i32
    %c0_i32_1 = arith.constant 0 : i32
    return %c0_i32, %c0_i32_0 : i32, i32
  }
  func.func @transform_6(%arg0: i32) -> (i32, i32) {
    %c0_i32 = arith.constant 0 : i32
    %c0_i32_0 = arith.constant 0 : i32
    %c0_i32_1 = arith.constant 0 : i32
    return %c0_i32, %c0_i32_0 : i32, i32
  }
  func.func @transform_7(%arg0: i32) -> (i32, i32) {
    %c0_i32 = arith.constant 0 : i32
    %c0_i32_0 = arith.constant 0 : i32
    return %arg0, %c0_i32 : i32, i32
  }
}

</mosaic_0001>

<bundles_post_ra>
// kernel: _run_single.1
= control target key start
LH: loop header
LB: loop body
LE: loop exit
PB: predicated region body
PF: predicated region fallthrough
CT: control target
= control target key end

     0   :  { %12 = vsyncpa [#allocation4], 0  ;;  %s1150_s0 = inlined_call_operand.hbm [shape: f32[2,31], index: 0, kind: input, shape index: {}]   ;;  %s1151_s1 = inlined_call_operand.hbm [shape: bf16[32,512], index: 1, kind: input, shape index: {}]   ;;  %s1152_s2 = inlined_call_operand.hbm [shape: f32[1,512], index: 2, kind: input, shape index: {}]   ;;  %s1153_s3 = inlined_call_operand.hbm [shape: bf16[512,128], index: 3, kind: input, shape index: {}]   ;;  %s1154_s4 = inlined_call_operand.vmem [shape: f32[1,128], index: 4, kind: input, shape index: {}]   ;;  %s1155_s5 = inlined_call_operand.hbm [shape: bf16[128,128], index: 5, kind: input, shape index: {}]   ;;  %s1156_s6 = inlined_call_operand.vmem [shape: f32[1,128], index: 6, kind: input, shape index: {}]   ;;  %s1157_s7 = inlined_call_operand.hbm [shape: f32[2,128], index: 7, kind: output, shape index: {}]  }
   0x1   :  { %13 = vsyncpa [#allocation7], 0 }
   0x2   :  { %14 = vsyncpa [#allocation10], 0 }
   0x3   :  { %15 = vsyncpa [#allocation5], 0  ;;  %s1055_s24 = smov [#allocation6]  }
   0x4   :  { %s31_s25 = sshll.u32 %s1055_s24, 4  ;;  %s32_s25 = int_to_ptr.vmem [resolvable:$true] %s31_s25 }
   0x5   :  { %s935_s26 = scalar_lea.vmem %s32_s25, 1024  ;;  %p940_p1 = scmp.lt.s32.totalorder %s32_s25, %s32_s25 }
   0x6   :  { %p936_p0 = scmp.ne.s32.totalorder %s32_s25, %s935_s26  ;;  %p941_p2 = scmp.lt.s32.totalorder %s935_s26, %s935_s26 }
   0x8   :  { %p942_p3 = por %p941_p2, %p940_p1 }
   0xa   :  { %p943_p4 = pnand %p942_p3, %p936_p0 }
   0xc   :  { %946 = shalt.err (!%p943_p4)
}
   0xd   :  { %s1056_s27 = smov 256   ;;  %s1057_s28 = smov 16  }
   0xe   :  { %37 = dma.hbm_to_vmem [thread:$0]  %s1151_s1, 1024, %s32_s25, [#allocation7], %s1056_s27, %s1056_s27, %s1057_s28  }
   0xf   :  { %s1058_s8 = smov [#allocation9]  }
  0x10   :  { %s53_s9 = sshll.u32 %s1058_s8, 4  ;;  %s54_s9 = int_to_ptr.vmem [resolvable:$true] %s53_s9 }
  0x11   :  { %s955_s10 = scalar_lea.vmem %s54_s9, 4096  ;;  %p960_p6 = scmp.lt.s32.totalorder %s54_s9, %s54_s9 }
  0x12   :  { %p956_p5 = scmp.ne.s32.totalorder %s54_s9, %s955_s10  ;;  %p961_p7 = scmp.lt.s32.totalorder %s955_s10, %s955_s10 }
  0x14   :  { %p962_p8 = por %p961_p7, %p960_p6 }
  0x16   :  { %p963_p9 = pnand %p962_p8, %p956_p5 }
  0x18   :  { %966 = shalt.err (!%p963_p9)
}
  0x19   :  { %s1059_s11 = smov 64   ;;  %s1060_s12 = smov 4  }
  0x1a   :  { %59 = dma.hbm_to_vmem [thread:$0]  %s1153_s3, 4096, %s54_s9, [#allocation10], %s1059_s11, %s1059_s11, %s1060_s12  }
  0x1b   :  { %s1061_s1 = smov [#allocation3]   ;;  %s1062_s16 = smov [#allocation8]  }
  0x1c   :  { %s22_s15 = sshll.u32 %s1061_s1, 4  ;;  %s44_s17 = sshll.u32 %s1062_s16, 4  ;;  %s23_s15 = int_to_ptr.vmem [resolvable:$true] %s22_s15  ;;  %s45_s17 = int_to_ptr.vmem [resolvable:$true] %s44_s17 }
  0x1d   :  { %s975_s18 = scalar_lea.vmem %s23_s15, 32  ;;  %p980_p11 = scmp.lt.s32.totalorder %s23_s15, %s23_s15 }
  0x1e   :  { %p976_p10 = scmp.ne.s32.totalorder %s23_s15, %s975_s18  ;;  %p981_p12 = scmp.lt.s32.totalorder %s975_s18, %s975_s18 }
  0x20   :  { %p982_p13 = por %p981_p12, %p980_p11 }
  0x22   :  { %p983_p0 = pnand %p982_p13, %p976_p10 }
  0x24   :  { %986 = shalt.err (!%p983_p0)
}
  0x25   :  { %25 = dma.hbm_to_vmem [thread:$0]  %s1150_s0, 32, %s23_s15, [#allocation4]  }
  0x26   :  { %s995_s21 = scalar_lea.vmem %s45_s17, 64  ;;  %p1000_p2 = scmp.lt.s32.totalorder %s45_s17, %s45_s17 }
  0x27   :  { %p996_p1 = scmp.ne.s32.totalorder %s45_s17, %s995_s21  ;;  %p1001_p3 = scmp.lt.s32.totalorder %s995_s21, %s995_s21 }
  0x29   :  { %p1002_p4 = por %p1001_p3, %p1000_p2 }
  0x2b   :  { %p1003_p5 = pnand %p1002_p4, %p996_p1 }
  0x2d   :  { %1006 = shalt.err (!%p1003_p5)
}
  0x2e   :  { %47 = dma.hbm_to_vmem [thread:$0]  %s1152_s2, 64, %s45_s17, [#allocation7]  }
  0x2f   :  { %s1063_s23 = smov [#allocation11]  }
  0x30   :  { %s67_s24 = sshll.u32 %s1063_s23, 4  ;;  %s68_s24 = int_to_ptr.vmem [resolvable:$true] %s67_s24 }
  0x31   :  { %s1015_s25 = scalar_lea.vmem %s68_s24, 1024  ;;  %p1020_p7 = scmp.lt.s32.totalorder %s68_s24, %s68_s24 }
  0x32   :  { %p1016_p6 = scmp.ne.s32.totalorder %s68_s24, %s1015_s25  ;;  %p1021_p8 = scmp.lt.s32.totalorder %s1015_s25, %s1015_s25 }
  0x34   :  { %p1022_p9 = por %p1021_p8, %p1020_p7 }
  0x36   :  { %p1023_p10 = pnand %p1022_p9, %p1016_p6 }
  0x38   :  { %1026 = shalt.err (!%p1023_p10)
}
  0x39   :  { %73 = dma.hbm_to_vmem [thread:$0]  %s1155_s5, 1024, %s68_s24, [#allocation10], %s1059_s11, %s1059_s11, %s1060_s12  }
  0x3a   :  { %1047 = dma.done.wait [#allocation4], 32  }
  0x3b   :  { %1048 = vsyncadd [#allocation4], 4294967264 }
  0x3c   :  { %1049 = dma.done.wait [#allocation7], 1088  }
  0x3d   :  { %1050 = vsyncadd [#allocation7], 4294966208 }
  0x3e   :  { %1051 = dma.done.wait [#allocation10], 5120  }
  0x3f   :  { %1052 = vsyncadd [#allocation10], 4294962176  ;;  %vm92_vm0 = vcmask 254976   ;;  %v1064_v0 = vmov 0   ;;  %v1065_v1 = vmov 0.0   ;;  %vm95_vm1 = vcmask 246784  }
  0x40   :  { %205 = vmatprep.mubr.bf16.mxu1 %v1064_v0  ;;  %93 = vst.msk [vmem:[#allocation2] sm:$0x3] %vm92_vm0, %v1065_v1  ;;  %v875_v2 = vld [vmem:[#allocation6 + $0x24] ss:$16 sps:$4 sm:$0xff]   ;;  %v877_v3 = vld [vmem:[#allocation6 + $0x20] ss:$16 sps:$4 sm:$0xff]   ;;  %v109_v45 = vlaneseq }
  0x41   :  { %185 = vmatprep.subr.bf16.mxu1 %v875_v2  ;;  %v878_v4 = vld [vmem:[#allocation6 + $0x4] ss:$16 sps:$4 sm:$0xff]   ;;  %v94_v5 = vld [vmem:[#allocation3] sm:$0x3]  ;;  %v880_v6 = vld [vmem:[#allocation6] ss:$16 sps:$4 sm:$0xff]  }
  0x42   :  { %186 = vmatpush1.bf16.msra.mxu1 %v877_v3  ;;  %96 = vst.msk [vmem:[#allocation2] sm:$0x3] %vm95_vm1, %v94_v5  ;;  %v883_v7 = vld [vmem:[#allocation6 + $0x2c] ss:$16 sps:$4 sm:$0xff]   ;;  %v881_v10 = vld [vmem:[#allocation6 + $0x28] ss:$16 sps:$4 sm:$0xff]  }
  0x43   :  { %187 = vmatprep.subr.bf16.mxu1 %v878_v4  ;;  %v887_v8 = vld [vmem:[#allocation9 + $0x78] sm:$0xff]   ;;  %v889_v11 = vld [vmem:[#allocation9 + $0x70] sm:$0xff]   ;;  %vm169_vm2 = vcmask 261120   ;;  %v891_v16 = vld [vmem:[#allocation9 + $0x68] sm:$0xff]   ;;  %v110_v46 = vshrl.u32 %v109_v45, 7  ;;  %vm1066_vm3 = vmmov 0  }
  0x44   :  { %v888_v9 = vld [vmem:[#allocation9 + $0x38] sm:$0xff]   ;;  %789 = vmatprep.subr.bf16.mxu0 %v887_v8  ;;  %v890_v12 = vld [vmem:[#allocation9 + $0x30] sm:$0xff]   ;;  %v893_v18 = vld [vmem:[#allocation9 + $0x28] sm:$0xff]   ;;  %s1067_s29 = smov [#allocation12]  }
  0x45   :  { %790 = vmatpush3.bf16.msra.mxu0 %v888_v9  ;;  %v886_v14 = vld [vmem:[#allocation6 + $0xc] ss:$16 sps:$4 sm:$0xff]   ;;  %v884_v17 = vld [vmem:[#allocation6 + $0x8] ss:$16 sps:$4 sm:$0xff]   ;;  %v111_v47 = vsub.s32 0, %v110_v46  ;;  %v115_v49 = vsub.s32 1, %v110_v46 }
  0x46   :  { %188 = vmatpush1.bf16.msra.mxu1 %v880_v6  ;;  %791 = vmatprep.subr.bf16.mxu0 %v889_v11  ;;  %v895_v19 = vld [vmem:[#allocation9 + $0x60] sm:$0xff]   ;;  %v892_v20 = vld [vmem:[#allocation9 + $0xf8] sm:$0xff]   ;;  %v896_v24 = vld [vmem:[#allocation9 + $0xf0] sm:$0xff]   ;;  %v119_v54 = vsub.s32 2, %v110_v46  ;;  %v123_v57 = vsub.s32 3, %v110_v46  ;;  %s726_s30 = sshll.u32 %s1067_s29, 4  ;;  %s727_s30 = int_to_ptr.vmem [resolvable:$true] %s726_s30 }
  0x47   :  { %226 = vmatprep.subr.bf16.mxu1 %v883_v7  ;;  %v894_v21 = vld [vmem:[#allocation9 + $0xb8] sm:$0xff]   ;;  %v897_v22 = vld [vmem:[#allocation9 + $0x20] sm:$0xff]   ;;  %v898_v25 = vld [vmem:[#allocation9 + $0xb0] sm:$0xff]   ;;  %p1032_p12 = scmp.lt.s32.totalorder %s727_s30, %s727_s30 }
  0x48   :  { %v899_v23 = vld [vmem:[#allocation9 + $0x58] sm:$0xff]   ;;  %v903_v27 = vld [vmem:[#allocation9 + $0x50] sm:$0xff]   ;;  %v900_v28 = vld [vmem:[#allocation9 + $0xe8] sm:$0xff]  }
  0x49   :  { %v97_v13 = vld [vmem:[#allocation2] sm:$0x3]  ;;  %792 = vmatpush3.bf16.msra.mxu0 %v890_v12  ;;  %v902_v29 = vld [vmem:[#allocation9 + $0xa8] sm:$0xff]   ;;  %v905_v30 = vld [vmem:[#allocation9 + $0x10] sm:$0xff]  }
  0x4a   :  { %v98_v15 = vpack.c.bf16 %v97_v13, %v97_v13  ;;  %793 = vmatprep.subr.bf16.mxu0 %v891_v16  ;;  %v901_v26 = vld [vmem:[#allocation9 + $0x18] sm:$0xff]   ;;  %v904_v31 = vld [vmem:[#allocation9 + $0xe0] sm:$0xff]   ;;  %v907_v33 = vld [vmem:[#allocation9 + $0x48] sm:$0xff]  }
  0x4b   :  { %v906_v32 = vld [vmem:[#allocation9 + $0xa0] sm:$0xff]   ;;  %v908_v34 = vld [vmem:[#allocation9 + $0xd8] sm:$0xff]   ;;  %v909_v35 = vld [vmem:[#allocation9 + $0x8] sm:$0xff]  }
  0x4c   :  { %745 = vmatmul.mubr.msk.bf16.vlgmr.msra.gmra.mxu1 %vm169_vm2, %v98_v15  ;;  %v910_v36 = vld [vmem:[#allocation9 + $0x98] sm:$0xff]   ;;  %v911_v37 = vld [vmem:[#allocation9 + $0x40] sm:$0xff]   ;;  %v912_v38 = vld [vmem:[#allocation9 + $0xd0] sm:$0xff]  }
  0x4d   :  { %227 = vmatpush1.bf16.msra.mxu1 %v881_v10  ;;  %246 = vmatprep.mubr.bf16.mxu1 %v1064_v0  ;;  %v913_v39 = vld [vmem:[#allocation9] sm:$0xff]   ;;  %v914_v40 = vld [vmem:[#allocation9 + $0x90] sm:$0xff]   ;;  %v915_v41 = vld [vmem:[#allocation9 + $0xc8] sm:$0xff]  }
  0x4e   :  { %228 = vmatprep.subr.bf16.mxu1 %v886_v14  ;;  %794 = vmatpush3.bf16.msra.mxu0 %v893_v18  ;;  %v916_v42 = vld [vmem:[#allocation9 + $0x88] sm:$0xff]   ;;  %v917_v43 = vld [vmem:[#allocation9 + $0xc0] sm:$0xff]   ;;  %v107_v48 = vld [vmem:[#allocation8] sm:$0xf] }
  0x4f   :  { %795 = vmatprep.subr.bf16.mxu0 %v895_v19  ;;  %v918_v44 = vld [vmem:[#allocation9 + $0x80] sm:$0xff]   ;;  %v112_v50 = vrot.slane %v107_v48, %v111_v47  ;;  %v116_v51 = vrot.slane %v107_v48, %v115_v49  ;;  %v120_v60 = vrot.slane %v107_v48, %v119_v54  ;;  %v124_v0 = vrot.slane %v107_v48, %v123_v57  ;;  %v919_v2 = vld [vmem:[#allocation11 + $0x38] sm:$0xff]   ;;  %v920_v8 = vld [vmem:[#allocation11 + $0x30] sm:$0xff]  }
  0x50   :  { %v921_v14 = vld [vmem:[#allocation11 + $0x28] sm:$0xff]   ;;  %v922_v16 = vld [vmem:[#allocation11 + $0x20] sm:$0xff]   ;;  %v924_v18 = vld [vmem:[#allocation11 + $0x10] sm:$0xff]  }
  0x51   :  { %229 = vmatpush1.bf16.msra.mxu1 %v884_v17  ;;  %v923_v17 = vld [vmem:[#allocation11 + $0x18] sm:$0xff]   ;;  %v925_v19 = vld [vmem:[#allocation11 + $0x8] sm:$0xff]  }
  0x52   :  { %811 = vmatprep.subr.bf16.mxu1 %v892_v20  ;;  %796 = vmatpush3.bf16.msra.mxu0 %v897_v22  ;;  %v926_v20 = vld [vmem:[#allocation11] sm:$0xff]  }
  0x53   :  { %797 = vmatprep.subr.bf16.mxu0 %v899_v23 }
  0x54   :  { %746 = vmatmul.mubr.msk.bf16.vlgmr.msra.gmra.mxu1 %vm169_vm2, %v98_v15 }
  0x55   :  { %812 = vmatpush3.bf16.msra.mxu1 %v894_v21 }
  0x56   :  { %813 = vmatprep.subr.bf16.mxu1 %v896_v24  ;;  %798 = vmatpush3.bf16.msra.mxu0 %v901_v26  ;;  %v747_v26 = vld [vmem:[%s1154_s4] ss:$0 sm:$0xff]  ;;  %s1027_s4 = scalar_lea.vmem %s727_s30, 32 }
  0x57   :  { %799 = vmatprep.subr.bf16.mxu0 %v903_v27  ;;  %p1028_p11 = scmp.ne.s32.totalorder %s727_s30, %s1027_s4  ;;  %p1033_p13 = scmp.lt.s32.totalorder %s1027_s4, %s1027_s4 }
  0x59   :  { %814 = vmatpush3.bf16.msra.mxu1 %v898_v25  ;;  %p1034_p0 = por %p1033_p13, %p1032_p12 }
  0x5a   :  { %815 = vmatprep.subr.bf16.mxu1 %v900_v28  ;;  %800 = vmatpush3.bf16.msra.mxu0 %v905_v30 }
  0x5b   :  { %801 = vmatprep.subr.bf16.mxu0 %v907_v33  ;;  %p1035_p1 = pnand %p1034_p0, %p1028_p11 }
  0x5d   :  { %816 = vmatpush3.bf16.msra.mxu1 %v902_v29 }
  0x5e   :  { %817 = vmatprep.subr.bf16.mxu1 %v904_v31  ;;  %802 = vmatpush3.bf16.msra.mxu0 %v909_v35 }
  0x5f   :  { %803 = vmatprep.subr.bf16.mxu0 %v911_v37 }
  0x61   :  { %818 = vmatpush3.bf16.msra.mxu1 %v906_v32 }
  0x62   :  { %819 = vmatprep.subr.bf16.mxu1 %v908_v34  ;;  %804 = vmatpush3.bf16.msra.mxu0 %v913_v39 }
  0x63   :  { %842 = vmatprep.subr.bf16.mxu0 %v1065_v1 }
  0x65   :  { %820 = vmatpush3.bf16.msra.mxu1 %v910_v36 }
  0x66   :  { %821 = vmatprep.subr.bf16.mxu1 %v912_v38 }
  0x69   :  { %822 = vmatpush3.bf16.msra.mxu1 %v914_v40 }
  0x6a   :  { %823 = vmatprep.subr.bf16.mxu1 %v915_v41 }
  0x6d   :  { %824 = vmatpush3.bf16.msra.mxu1 %v916_v42 }
  0x6e   :  { %825 = vmatprep.subr.bf16.mxu1 %v917_v43 }
  0x71   :  { %826 = vmatpush3.bf16.msra.mxu1 %v918_v44 }
 0x10c   :  { %v207_v52 = vpop.f32.mrf.mxu1 }
 0x10d   :  { %v208_v53 = vadd.f32 %v207_v52, %v112_v50 }
 0x10e   :  { %v209_v55 = vpop.f32.mrf.mxu1 }
 0x10f   :  { %v210_v56 = vadd.f32 %v209_v55, %v116_v51  ;;  %v255_v58 = vmax.f32 %v208_v53, 0.0 }
 0x110   :  { %v211_v59 = vpop.f32.mrf.mxu1 }
 0x111   :  { %v256_v61 = vmax.f32 %v210_v56, 0.0  ;;  %v259_v3 = vpack.c.bf16 %v255_v58, %v255_v58 }
 0x112   :  { %v212_v62 = vpop.f32.mrf.mxu1 }
 0x113   :  { %v260_v63 = vpack.c.bf16 %v256_v61, %v256_v61 }
 0x114   :  { %v248_v4 = vpop.f32.mrf.mxu1 }
 0x115   :  { %v249_v5 = vadd.f32 %v248_v4, %v120_v60  ;;  %558 = vmatprep.mubr.bf16.mxu0 %v260_v63 }
 0x116   :  { %v250_v6 = vpop.f32.mrf.mxu1  ;;  %559 = vmatmul.mubr.bf16.vlgmr.msra.gmra.mxu0 %v259_v3 }
 0x117   :  { %v251_v7 = vadd.f32 %v250_v6, %v124_v0  ;;  %843 = vmatpush3.bf16.msra.mxu0 %v919_v2  ;;  %v257_v9 = vmax.f32 %v249_v5, 0.0  ;;  %858 = vmatprep.mubr.msk.bf16.mxu0 %vm1066_vm3, %v1065_v1 }
 0x118   :  { %v252_v10 = vpop.f32.mrf.mxu1  ;;  %844 = vmatprep.subr.bf16.mxu0 %v1065_v1 }
 0x119   :  { %v258_v11 = vmax.f32 %v251_v7, 0.0  ;;  %v261_v15 = vpack.c.bf16 %v257_v9, %v257_v9 }
 0x11a   :  { %v253_v12 = vpop.f32.mrf.mxu1 }
 0x11b   :  { %v262_v13 = vpack.c.bf16 %v258_v11, %v258_v11  ;;  %845 = vmatpush3.bf16.msra.mxu0 %v920_v8 }
 0x11c   :  { %846 = vmatprep.subr.bf16.mxu0 %v1065_v1 }
 0x11d   :  { %598 = vmatprep.mubr.bf16.mxu1 %v262_v13 }
 0x11e   :  { %599 = vmatmul.mubr.bf16.vlgmr.msra.gmra.mxu1 %v261_v15 }
 0x11f   :  { %847 = vmatpush3.bf16.msra.mxu0 %v921_v14 }
 0x120   :  { %848 = vmatprep.subr.bf16.mxu0 %v1065_v1 }
 0x123   :  { %849 = vmatpush3.bf16.msra.mxu0 %v922_v16 }
 0x124   :  { %850 = vmatprep.subr.bf16.mxu0 %v1065_v1 }
 0x127   :  { %851 = vmatpush3.bf16.msra.mxu0 %v923_v17 }
 0x128   :  { %852 = vmatprep.subr.bf16.mxu0 %v1065_v1 }
 0x12b   :  { %853 = vmatpush3.bf16.msra.mxu0 %v924_v18 }
 0x12c   :  { %854 = vmatprep.subr.bf16.mxu0 %v1065_v1 }
 0x12f   :  { %855 = vmatpush3.bf16.msra.mxu0 %v925_v19 }
 0x130   :  { %856 = vmatprep.subr.bf16.mxu0 %v1065_v1  ;;  %v780_v1 = vld [vmem:[%s1156_s6] ss:$0 sm:$0xff] }
 0x133   :  { %857 = vmatpush3.bf16.msra.mxu0 %v926_v20 }
 0x1d6   :  { %v805_v21 = vpop.f32.mrf.mxu0 }
 0x1d8   :  { %v806_v22 = vpop.f32.mrf.mxu0 }
 0x1d9   :  { %v807_v25 = vadd.f32 %v806_v22, %v805_v21 }
 0x1da   :  { %v808_v23 = vpop.f32.mrf.mxu0 }
 0x1db   :  { %v561_v29 = vadd.f32 %v807_v25, %v747_v26 }
 0x1dc   :  { %v809_v24 = vpop.f32.mrf.mxu0 }
 0x1de   :  { %v827_v27 = vpop.f32.mrf.mxu1 }
 0x1e0   :  { %v828_v28 = vpop.f32.mrf.mxu1 }
 0x1e1   :  { %v829_v30 = vadd.f32 %v828_v28, %v827_v27 }
 0x1e2   :  { %v830_v31 = vpop.f32.mrf.mxu1 }
 0x1e3   :  { %v601_v32 = vadd.f32 %v829_v30, %v561_v29 }
 0x1e4   :  { %v831_v33 = vpop.f32.mrf.mxu1 }
 0x1e5   :  { %v606_v34 = vmax.f32 %v601_v32, 0.0 }
 0x1e7   :  { %v607_v35 = vpack.c.bf16 %v606_v34, %v606_v34 }
 0x1e9   :  { %859 = vmatmul.mubr.bf16.vlgmr.msra.gmra.mxu0 %v607_v35 }
 0x2a9   :  { %v713_v36 = vpop.f32.mrf.mxu0 }
 0x2aa   :  { %v714_v37 = vadd.f32 %v780_v1, %v713_v36 }
 0x2ab   :  { %v860_v38 = vpop.f32.mrf.mxu0 }
 0x2ac   :  { %719 = vst [vmem:[#allocation12] sm:$0x3] %v714_v37 }
 0x2ad   :  { %v716_v39 = vpop.f32.mrf.mxu0 }
 0x2ae   :  { %1038 = shalt.err (!%p1035_p1)
}
 0x2af   :  { %729 = dma.vmem_to_hbm [thread:$0]  %s727_s30, 32, %s1157_s7, [#allocation5]   ;;  %v861_v40 = vpop.f32.mrf.mxu0 }
 0x2b0   :  { %1053 = dma.done.wait [#allocation5], 32  }
 0x2b1   :  { %1054 = vsyncadd [#allocation5], 4294967264 }
 0x2b2   :  { %733 = vsyncpa [#allocation4], 1 }
 0x2b3   :  { %734 = vsyncpa [#allocation7], 1 }
 0x2b4   :  { %735 = vsyncpa [#allocation10], 1 }
 0x2b5   :  { %736 = vsyncpa [#allocation5], 1 }

</bundles_post_ra>
